<compile_context>
chip_gen: v5e
topology: v5e:2x2
jax: 0.10.0
libtpu: 0.0.40
codegen_flags: <defaults>
</compile_context>

<pallas_src>
import functools

import jax
import jax.numpy as jnp
from jax.experimental import pallas as pl
from jax.experimental.pallas import tpu as pltpu


def _ls_ce_kernel(logits_ref, target_ref, out_ref, acc_smooth_ref, acc_nll_ref,
                  *, n_rows: int, n_classes: int, block_n: int, eps: float):
    pid = pl.program_id(0)

    @pl.when(pid == 0)
    def _init():
        acc_smooth_ref[...] = jnp.zeros_like(acc_smooth_ref)
        acc_nll_ref[...] = jnp.zeros_like(acc_nll_ref)

    x = logits_ref[...].astype(jnp.float32)                       # (TN, C)

    # Numerically stable pieces of log_softmax (log_preds never materialized).
    m = jnp.max(x, axis=-1, keepdims=True)                        # (TN, 1)
    z = x - m                                                     # (TN, C)
    lse = jnp.log(jnp.sum(jnp.exp(z), axis=-1, keepdims=True))    # (TN, 1)
    sum_z = jnp.sum(z, axis=-1, keepdims=True)                    # (TN, 1)

    # Gather z[i, target[i]] via an iota-compare one-hot lane reduction.
    col_ids = jax.lax.broadcasted_iota(jnp.int32, z.shape, 1)     # (TN, C)
    tgt = target_ref[...]                                         # (TN, 1) int32
    picked_z = jnp.sum(jnp.where(col_ids == tgt, z, 0.0),
                       axis=-1, keepdims=True)                    # (TN, 1)

    # Mask rows that are batch padding (N not a multiple of TN).
    row_ids = pid * block_n + jax.lax.broadcasted_iota(
        jnp.int32, (block_n, 1), 0)                               # (TN, 1)
    valid = (row_ids < n_rows).astype(jnp.float32)                # (TN, 1)

    smooth_rows = (n_classes * lse - sum_z) * valid               # -sum(log_preds)
    nll_rows = (lse - picked_z) * valid                           # -log_preds[tgt]

    # Accumulate raw sums only; all scaling happens once in the epilogue.
    acc_smooth_ref[...] += jnp.sum(smooth_rows, axis=0, keepdims=True)
    acc_nll_ref[...] += jnp.sum(nll_rows, axis=0, keepdims=True)

    @pl.when(pid == pl.num_programs(0) - 1)
    def _finalize():
        inv_n = jnp.float32(1.0 / n_rows)
        out_ref[...] = (acc_smooth_ref[...] * jnp.float32(eps / n_classes)
                        + acc_nll_ref[...] * jnp.float32(1.0 - eps)) * inv_n


def make_label_smoothing_ce(n: int, c: int, *, eps: float = 0.1,
                            block_n: int | None = None,
                            vmem_limit_bytes: int | None = None):
    """Returns fn(logits[N, C], targets[N] int) -> scalar f32 loss ('mean')."""
    if block_n is None:
        # ~2 MiB f32 logits tile (double-buffered => ~4 MiB), multiple of 8,
        # capped at the (rounded-up) batch size.  Fits v5e/v6e/v7x scoped VMEM.
        target_tile_bytes = 2 * 1024 * 1024
        rows = max(8, target_tile_bytes // max(1, 4 * c))
        block_n = int(max(8, min((rows // 8) * 8, ((n + 7) // 8) * 8)))
    assert block_n % 8 == 0, "block_n must be a multiple of 8 (sublane tiling)"

    n_pad = pl.cdiv(n, block_n) * block_n
    num_tiles = n_pad // block_n

    kernel = functools.partial(_ls_ce_kernel, n_rows=n, n_classes=c,
                               block_n=block_n, eps=eps)

    grid_spec = pltpu.PrefetchScalarGridSpec(
        num_scalar_prefetch=0,
        grid=(num_tiles,),
        in_specs=[
            pl.BlockSpec((block_n, c), lambda i: (i, 0)),   # logits tile
            pl.BlockSpec((block_n, 1), lambda i: (i, 0)),   # targets tile
        ],
        out_specs=pl.BlockSpec((1, 1), lambda i: (0, 0)),   # resident scalar out
        scratch_shapes=[
            pltpu.VMEM((1, 1), jnp.float32),                # acc: smoothing sum
            pltpu.VMEM((1, 1), jnp.float32),                # acc: nll sum
        ],
    )

    call = pl.pallas_call(
        kernel,
        out_shape=jax.ShapeDtypeStruct((1, 1), jnp.float32),
        grid_spec=grid_spec,
        compiler_params=pltpu.CompilerParams(
            dimension_semantics=("arbitrary",),             # serial reduction axis
            vmem_limit_bytes=vmem_limit_bytes,
        ),
    )

    def run(logits, targets):
        assert logits.shape == (n, c), logits.shape
        assert targets.shape == (n,), targets.shape
        tgt = targets.astype(jnp.int32).reshape(n, 1)
        if n_pad != n:
            logits = jnp.pad(logits, ((0, n_pad - n), (0, 0)))
            tgt = jnp.pad(tgt, ((0, n_pad - n), (0, 0)))
        return call(logits, tgt)[0, 0]

    return jax.jit(run)


def _reference(logits, targets, eps=0.1):
    """Pure-JAX reference mirroring the PyTorch forward (reduction='mean')."""
    c = logits.shape[-1]
    log_preds = jax.nn.log_softmax(logits.astype(jnp.float32), axis=-1)
    loss = jnp.mean(-jnp.sum(log_preds, axis=-1))
    nll = jnp.mean(-jnp.take_along_axis(
        log_preds, targets.astype(jnp.int32)[:, None], axis=-1)[:, 0])
    return loss * eps / c + (1.0 - eps) * nll


if __name__ == "__main__":
    EPS = 0.1
    key = jax.random.PRNGKey(0)
    k1, k2, k3, k4 = jax.random.split(key, 4)

    # Case 1: N a multiple of the tile (grid of 2 -> exercises the accumulator).
    N, C = 16, 128
    logits = jax.random.normal(k1, (N, C), dtype=jnp.float32)
    targets = jax.random.randint(k2, (N,), 0, C, dtype=jnp.int32)
    out = jax.block_until_ready(
        make_label_smoothing_ce(N, C, eps=EPS, block_n=8)(logits, targets))
    ref = jax.block_until_ready(_reference(logits, targets, eps=EPS))
    assert jnp.allclose(out, ref, atol=1e-5, rtol=1e-5), (out, ref)

    # Case 2: ragged N (padded rows must be masked out of both sums).
    N2 = 12
    logits2 = jax.random.normal(k3, (N2, C), dtype=jnp.float32)
    targets2 = jax.random.randint(k4, (N2,), 0, C, dtype=jnp.int32)
    out2 = jax.block_until_ready(
        make_label_smoothing_ce(N2, C, eps=EPS, block_n=8)(logits2, targets2))
    ref2 = jax.block_until_ready(_reference(logits2, targets2, eps=EPS))
    assert jnp.allclose(out2, ref2, atol=1e-5, rtol=1e-5), (out2, ref2)

    print("KERNEL_OK")
</pallas_src>

<mosaic_0001>
module attributes {stable_mosaic.version = 11 : i64} {
  func.func @_ls_ce_kernel(%arg0: i32, %arg1: memref<8x128xf32, #tpu.memory_space<vmem>>, %arg2: memref<8x1xi32, #tpu.memory_space<vmem>>, %arg3: memref<1x1xf32, #tpu.memory_space<vmem>>, %arg4: memref<1x1xf32, #tpu.memory_space<vmem>>, %arg5: memref<1x1xf32, #tpu.memory_space<vmem>>) attributes {dimension_semantics = [#tpu.dimension_semantics<arbitrary>], iteration_bounds = array<i64: 2>, scalar_prefetch = 0 : i64, scratch_operands = 2 : i64, tpu.core_type = #tpu.core_type<tc>, window_params = [{transform_indices = @transform_0, window_bounds = array<i64: 8, 128>}, {transform_indices = @transform_1, window_bounds = array<i64: 8, 1>}, {pipeline_mode = #tpu.pipeline_mode<synchronous>, transform_indices = @transform_2, window_bounds = array<i64: 1, 1>}]} {
    %c0_i32 = arith.constant 0 : i32
    %0 = arith.cmpi eq, %arg0, %c0_i32 : i32
    %1 = arith.extui %0 : i1 to i32
    %c0_i32_0 = arith.constant 0 : i32
    %2 = arith.cmpi ne, %1, %c0_i32_0 : i32
    scf.if %2 {
      %cst_20 = arith.constant 0.000000e+00 : f32
      %49 = vector.broadcast %cst_20 : f32 to vector<1x1xf32>
      %c0_21 = arith.constant 0 : index
      %c0_22 = arith.constant 0 : index
      %50 = vector.load %arg4[%c0_21, %c0_22] : memref<1x1xf32, #tpu.memory_space<vmem>>, vector<1x1xf32>
      tpu.vector_store %arg4[%c0_21, %c0_22], %49 {strides = array<i32>} : memref<1x1xf32, #tpu.memory_space<vmem>>, vector<1x1xf32>,
      %cst_23 = arith.constant 0.000000e+00 : f32
      %51 = vector.broadcast %cst_23 : f32 to vector<1x1xf32>
      %c0_24 = arith.constant 0 : index
      %c0_25 = arith.constant 0 : index
      %52 = vector.load %arg5[%c0_24, %c0_25] : memref<1x1xf32, #tpu.memory_space<vmem>>, vector<1x1xf32>
      tpu.vector_store %arg5[%c0_24, %c0_25], %51 {strides = array<i32>} : memref<1x1xf32, #tpu.memory_space<vmem>>, vector<1x1xf32>,
    } else {
    }
    %c0 = arith.constant 0 : index
    %c0_1 = arith.constant 0 : index
    %3 = vector.load %arg1[%c0, %c0_1] : memref<8x128xf32, #tpu.memory_space<vmem>>, vector<8x128xf32>
    %cst = arith.constant dense<0xFF800000> : vector<8xf32>
    %4 = vector.multi_reduction <maximumf>, %3, %cst [1] : vector<8x128xf32> to vector<8xf32>
    %5 = vector.shape_cast %4 : vector<8xf32> to vector<8x1xf32>
    %6 = vector.broadcast %5 : vector<8x1xf32> to vector<8x128xf32>
    %7 = arith.subf %3, %6 : vector<8x128xf32>
    %8 = math.exp %7 : vector<8x128xf32>
    %cst_2 = arith.constant dense<0.000000e+00> : vector<8xf32>
    %9 = vector.multi_reduction <add>, %8, %cst_2 [1] : vector<8x128xf32> to vector<8xf32>
    %10 = vector.shape_cast %9 : vector<8xf32> to vector<8x1xf32>
    %11 = math.log %10 : vector<8x1xf32>
    %cst_3 = arith.constant dense<0.000000e+00> : vector<8xf32>
    %12 = vector.multi_reduction <add>, %7, %cst_3 [1] : vector<8x128xf32> to vector<8xf32>
    %13 = vector.shape_cast %12 : vector<8xf32> to vector<8x1xf32>
    %14 = tpu.iota {dimensions = array<i32: 1>} : vector<8x128xi32>
    %c0_4 = arith.constant 0 : index
    %c0_5 = arith.constant 0 : index
    %15 = vector.load %arg2[%c0_4, %c0_5] : memref<8x1xi32, #tpu.memory_space<vmem>>, vector<8x1xi32>
    %16 = vector.broadcast %15 : vector<8x1xi32> to vector<8x128xi32>
    %17 = arith.cmpi eq, %14, %16 : vector<8x128xi32>
    %cst_6 = arith.constant 0.000000e+00 : f32
    %18 = vector.broadcast %cst_6 : f32 to vector<8x128xf32>
    %19 = arith.select %17, %7, %18 : vector<8x128xi1>, vector<8x128xf32>
    %cst_7 = arith.constant dense<0.000000e+00> : vector<8xf32>
    %20 = vector.multi_reduction <add>, %19, %cst_7 [1] : vector<8x128xf32> to vector<8xf32>
    %21 = vector.shape_cast %20 : vector<8xf32> to vector<8x1xf32>
    %c8_i32 = arith.constant 8 : i32
    %22 = arith.muli %arg0, %c8_i32 : i32
    %23 = tpu.iota {dimensions = array<i32: 0>} : vector<8x1xi32>
    %24 = vector.broadcast %22 : i32 to vector<8x1xi32>
    %25 = arith.addi %24, %23 : vector<8x1xi32>
    %c16_i32 = arith.constant 16 : i32
    %26 = vector.broadcast %c16_i32 : i32 to vector<8x1xi32>
    %27 = arith.cmpi slt, %25, %26 : vector<8x1xi32>
    %28 = arith.extui %27 : vector<8x1xi1> to vector<8x1xi32>
    %29 = arith.sitofp %28 : vector<8x1xi32> to vector<8x1xf32>
    %cst_8 = arith.constant 1.280000e+02 : f32
    %30 = vector.broadcast %cst_8 : f32 to vector<8x1xf32>
    %31 = arith.mulf %30, %11 : vector<8x1xf32>
    %32 = arith.subf %31, %13 : vector<8x1xf32>
    %33 = arith.mulf %32, %29 : vector<8x1xf32>
    %34 = arith.subf %11, %21 : vector<8x1xf32>
    %35 = arith.mulf %34, %29 : vector<8x1xf32>
    %c0_9 = arith.constant 0 : index
    %c0_10 = arith.constant 0 : index
    %36 = vector.load %arg4[%c0_9, %c0_10] : memref<1x1xf32, #tpu.memory_space<vmem>>, vector<1x1xf32>
    %cst_11 = arith.constant dense<0.000000e+00> : vector<1xf32>
    %37 = vector.multi_reduction <add>, %33, %cst_11 [0] : vector<8x1xf32> to vector<1xf32>
    %38 = vector.shape_cast %37 : vector<1xf32> to vector<1x1xf32>
    %39 = arith.addf %36, %38 : vector<1x1xf32>
    %c0_12 = arith.constant 0 : index
    %c0_13 = arith.constant 0 : index
    %40 = vector.load %arg4[%c0_12, %c0_13] : memref<1x1xf32, #tpu.memory_space<vmem>>, vector<1x1xf32>
    tpu.vector_store %arg4[%c0_12, %c0_13], %39 {strides = array<i32>} : memref<1x1xf32, #tpu.memory_space<vmem>>, vector<1x1xf32>,
    %c0_14 = arith.constant 0 : index
    %c0_15 = arith.constant 0 : index
    %41 = vector.load %arg5[%c0_14, %c0_15] : memref<1x1xf32, #tpu.memory_space<vmem>>, vector<1x1xf32>
    %cst_16 = arith.constant dense<0.000000e+00> : vector<1xf32>
    %42 = vector.multi_reduction <add>, %35, %cst_16 [0] : vector<8x1xf32> to vector<1xf32>
    %43 = vector.shape_cast %42 : vector<1xf32> to vector<1x1xf32>
    %44 = arith.addf %41, %43 : vector<1x1xf32>
    %c0_17 = arith.constant 0 : index
    %c0_18 = arith.constant 0 : index
    %45 = vector.load %arg5[%c0_17, %c0_18] : memref<1x1xf32, #tpu.memory_space<vmem>>, vector<1x1xf32>
    tpu.vector_store %arg5[%c0_17, %c0_18], %44 {strides = array<i32>} : memref<1x1xf32, #tpu.memory_space<vmem>>, vector<1x1xf32>,
    %c1_i32 = arith.constant 1 : i32
    %46 = arith.cmpi eq, %arg0, %c1_i32 : i32
    %47 = arith.extui %46 : i1 to i32
    %c0_i32_19 = arith.constant 0 : i32
    %48 = arith.cmpi ne, %47, %c0_i32_19 : i32
    scf.if %48 {
      %c0_20 = arith.constant 0 : index
      %c0_21 = arith.constant 0 : index
      %49 = vector.load %arg4[%c0_20, %c0_21] : memref<1x1xf32, #tpu.memory_space<vmem>>, vector<1x1xf32>
      %cst_22 = arith.constant 7.812500e-04 : f32
      %50 = vector.broadcast %cst_22 : f32 to vector<1x1xf32>
      %51 = arith.mulf %49, %50 : vector<1x1xf32>
      %c0_23 = arith.constant 0 : index
      %c0_24 = arith.constant 0 : index
      %52 = vector.load %arg5[%c0_23, %c0_24] : memref<1x1xf32, #tpu.memory_space<vmem>>, vector<1x1xf32>
      %cst_25 = arith.constant 0.899999976 : f32
      %53 = vector.broadcast %cst_25 : f32 to vector<1x1xf32>
      %54 = arith.mulf %52, %53 : vector<1x1xf32>
      %55 = arith.addf %51, %54 : vector<1x1xf32>
      %cst_26 = arith.constant 6.250000e-02 : f32
      %56 = vector.broadcast %cst_26 : f32 to vector<1x1xf32>
      %57 = arith.mulf %55, %56 : vector<1x1xf32>
      %c0_27 = arith.constant 0 : index
      %c0_28 = arith.constant 0 : index
      %58 = vector.load %arg3[%c0_27, %c0_28] : memref<1x1xf32, #tpu.memory_space<vmem>>, vector<1x1xf32>
      tpu.vector_store %arg3[%c0_27, %c0_28], %57 {strides = array<i32>} : memref<1x1xf32, #tpu.memory_space<vmem>>, vector<1x1xf32>,
    } else {
    }
    return
  }
  func.func @transform_0(%arg0: i32) -> (i32, i32) {
    %c0_i32 = arith.constant 0 : i32
    %c0_i32_0 = arith.constant 0 : i32
    return %arg0, %c0_i32 : i32, i32
  }
  func.func @transform_1(%arg0: i32) -> (i32, i32) {
    %c0_i32 = arith.constant 0 : i32
    %c0_i32_0 = arith.constant 0 : i32
    return %arg0, %c0_i32 : i32, i32
  }
  func.func @transform_2(%arg0: i32) -> (i32, i32) {
    %c0_i32 = arith.constant 0 : i32
    %c0_i32_0 = arith.constant 0 : i32
    %c0_i32_1 = arith.constant 0 : i32
    return %c0_i32, %c0_i32_0 : i32, i32
  }
}

</mosaic_0001>

<bundles_post_ra>
// kernel: run.1
= control target key start
LH: loop header
LB: loop body
LE: loop exit
PB: predicated region body
PF: predicated region fallthrough
CT: control target
= control target key end

     0   :  { %7 = vsyncpa [#allocation5], 0  ;;  %s372_s9 = smov 0   ;;  %s400_s0 = inlined_call_operand.vmem [shape: f32[16,128], index: 0, kind: input, shape index: {}]   ;;  %s401_s1 = inlined_call_operand.vmem [shape: s32[16,1], index: 1, kind: input, shape index: {}]   ;;  %s402_s2 = inlined_call_operand.hbm [shape: f32[1,1], index: 2, kind: output, shape index: {}]  }
   0x1 LB: > { %s378_s10 = sadd.s32 4294967295, %s351_s9   ;;  %p279_p0 = scmp.ge.s32.totalorder %s351_s9, 1  ;;  %s351_s9 = sphi %s372_s9, %s13_s9  }
   0x2   : > { %p116_p1 = scmp.lt.s32.totalorder %s351_s9, 3 }
   0x4   : > { %p117_p2 = pnand %p279_p0, %p116_p1 }
   0x5   : > { %p136_p3 = scmp.lt.s32.totalorder (!%p117_p2), %s378_s10, 1  ;;  %p282_p4 = scmp.ne.s32.totalorder (!%p117_p2), %s378_s10, 0 }
   0x6   : > { %120 = sbr.rel (%p117_p2) target bundleno = 313 (0x139), region = 28 }
   0xb   : > { %s137_s11 = scalar_select %p136_p3, %s378_s10, 1 }
   0xc   : > { %147 = sbr.rel (%p282_p4) target bundleno = 20 (0x14), region = 32 }
   0xd   : > { %s280_s12 = sshll.u32 %s137_s11, 3 }
   0xe   : > { %s139_s15 = scalar_lea.vmem %s400_s0, %s280_s12  ;;  %s143_s18 = scalar_lea.vmem %s401_s1, %s280_s12 }
  0x11   : > { %vm148_vm0 = vcmask 0   ;;  %v353_v0 = vmov 0.0  }
  0x12   : > { %149 = vst.msk [vmem:[#allocation2] sm:$0x1] %vm148_vm0, %v353_v0 }
  0x13   : > { %150 = vst.msk [vmem:[#allocation3] sm:$0x1] %vm148_vm0, %v353_v0 }
  0x14 PF: > { %v151_v1 = vld [vmem:[%s139_s15] sm:$0xff]  ;;  %v354_v2 = vmov 0   ;;  %v163_v8 = vlaneseq  ;;  %s283_s19 = sshll.u32 %s378_s10, 3  ;;  %v355_v18 = vmov 0.0   ;;  %vm194_vm3 = vcmask 0   ;;  %p285_p5 = scmp.ne.s32.totalorder %s378_s10, 1 }
  0x15   : > { %152 = vmax.xlane.f32.xlu0 %v151_v1  ;;  %v165_v3 = vld [vmem:[%s143_s18] sm:$0xff]  ;;  %v176_v14 = vstv %s283_s19 }
  0x16   : > { %308 = vset.pattern.permute.xlu0 %v354_v2  ;;  %v164_v9 = vand.u32 127, %v163_v8  ;;  %v175_v12 = vshrl.u32 %v163_v8, 7 }
  0x18   : > { %v177_v15 = vadd.s32 %v176_v14, %v175_v12 }
  0x19   : > { %v186_v38 = vld [vmem:[#allocation2] sm:$0x1] }
  0x1a   : > { %vm178_vm2 = vcmp.lt.s32.totalorder %v177_v15, 16  ;;  %v196_v37 = vld [vmem:[#allocation3] sm:$0x1] }
  0x1b   : > { %v284_v19 = vsel %vm178_vm2, 1.0, %v355_v18 }
  0x29   : > { %167 = vperm.xlu0 %308, %v165_v3  }
  0x88   : > { %v153_v4 = vpop.xlane.xlu0 %152 }
  0x89   : > { %v154_v5 = vsub.f32 %v151_v1, %v153_v4 }
  0x8b   : > { %v155_v6 = vmul.f32 1.442695, %v154_v5 }
  0x8d   : > { %309 = vpow2.f32 %v155_v6 }
  0x93   : > { %v310_v7 = vpop.eup %309 }
  0x94   : > { %157 = vadd.xlane.f32.xlu1 %v310_v7 }
  0x9b   : > { %v168_v10 = vpop.permute.xlu0 %167 }
  0x9c   : > { %vm169_vm1 = vcmp.eq.s32.totalorder %v164_v9, %v168_v10  ;;  %161 = vadd.xlane.f32.xlu1 %v154_v5 }
  0x9d   : > { %v170_v11 = vsel %vm169_vm1, %v154_v5, 0.0 }
  0x9e   : > { %171 = vadd.xlane.f32.xlu2 %v170_v11 }
 0x107   : > { %v158_v13 = vpop.xlane.xlu1 %157 }
 0x108   : > { %311 = vlog2.f32 %v158_v13 }
 0x10e   : > { %v312_v16 = vpop.eup %311 }
 0x10f   : > { %v160_v17 = vmul.f32 0.6931472, %v312_v16  ;;  %v162_v22 = vpop.xlane.xlu1 %161 }
 0x111   : > { %v181_v20 = vmul.f32 128.0, %v160_v17  ;;  %v172_v21 = vpop.xlane.xlu2 %171 }
 0x112   : > { %v184_v23 = vsub.f32 %v160_v17, %v172_v21 }
 0x113   : > { %v182_v24 = vsub.f32 %v181_v20, %v162_v22 }
 0x114   : > { %v185_v25 = vmul.f32 %v284_v19, %v184_v23 }
 0x115   : > { %v183_v26 = vmul.f32 %v284_v19, %v182_v24 }
 0x116   : > { %v197_v27 = vrot.slane %v185_v25, 4 }
 0x117   : > { %v187_v28 = vrot.slane %v183_v26, 4 }
 0x118   : > { %v198_v29 = vadd.f32 %v197_v27, %v185_v25 }
 0x119   : > { %v188_v30 = vadd.f32 %v187_v28, %v183_v26 }
 0x11a   : > { %v199_v31 = vrot.slane %v198_v29, 2 }
 0x11b   : > { %v189_v32 = vrot.slane %v188_v30, 2 }
 0x11c   : > { %v200_v33 = vadd.f32 %v199_v31, %v198_v29 }
 0x11d   : > { %v190_v34 = vadd.f32 %v189_v32, %v188_v30 }
 0x11e   : > { %v201_v35 = vrot.slane %v200_v33, 1 }
 0x11f   : > { %v191_v36 = vrot.slane %v190_v34, 1 }
 0x120   : > { %v202_v39 = vadd.f32 %v201_v35, %v200_v33 }
 0x121   : > { %v192_v40 = vadd.f32 %v191_v36, %v190_v34  ;;  %208 = sbr.rel (%p285_p5) target bundleno = 308 (0x134), region = 36 }
 0x122   : > { %v203_v41 = vadd.f32 %v202_v39, %v196_v37 }
 0x123   : > { %v193_v42 = vadd.f32 %v192_v40, %v186_v38 }
 0x124   : > { %204 = vst.msk [vmem:[#allocation3] sm:$0x1] %vm194_vm3, %v203_v41 }
 0x125   : > { %195 = vst.msk [vmem:[#allocation2] sm:$0x1] %vm194_vm3, %v193_v42 }
 0x12b   : > { %v211_v44 = vld [vmem:[#allocation3] sm:$0x1] }
 0x12c   : > { %v209_v43 = vld [vmem:[#allocation2] sm:$0x1]  ;;  %v212_v46 = vmul.f32 0.9, %v211_v44 }
 0x12d   : > { %v210_v45 = vmul.f32 0.00078125, %v209_v43 }
 0x12f   : > { %v213_v47 = vadd.f32 %v212_v46, %v210_v45 }
 0x131   : > { %v214_v48 = vmul.f32 0.0625, %v213_v47 }
 0x133   : > { %215 = vst.msk [vmem:[#allocation4] sm:$0x1] %vm194_vm3, %v214_v48 }
 0x134 PF: > { %p294_p6 = scmp.eq.s32.totalorder %s378_s10, 1  ;;  %s356_s20 = smov [#allocation4]  }
 0x135   : > { %s222_s21 = sshll.u32 %s356_s20, 4  ;;  %s224_s24 = sshll.u32 %s402_s2, 4  ;;  %s223_s21 = int_to_ptr.vmem [resolvable:$true] %s222_s21  ;;  %s225_s24 = int_to_ptr.hbm [resolvable:$true] %s224_s24 }
 0x136   : > { %291 = dma.vmem_to_hbm [thread:$0]  (%p294_p6), %s223_s21, 16, %s225_s24, [#allocation5]  }
 0x137   : > { %346 = dma.done.wait (%p294_p6), [#allocation5], 16  }
 0x138   : > { %348 = vsyncadd (%p294_p6), [#allocation5], 4294967280 }
 0x139 PF: > { %s13_s9 = sadd.s32 1, %s351_s9  }
 0x13a   : > { %p10_p7 = scmp.ge.s32.totalorder %s13_s9, 4  }
 0x13c   :  { %12 = sbr.rel (!%p10_p7) target bundleno = 1 (0x1), region = 66 }
 0x141   :  { %238 = vsyncpa [#allocation5], 1 }
 0x142   :  { %240 = vsyncpa [#allocation5 + $0x1], 1 }

</bundles_post_ra>
